<compile_context>
chip_gen: v7x
topology: tpu7x:2x2x1
jax: 0.10.0
libtpu: 0.0.40
codegen_flags: <defaults>
</compile_context>

<pallas_src>
import functools
import math

import jax
import jax.numpy as jnp
from jax.experimental import pallas as pl
from jax.experimental.pallas import tpu as pltpu


# ---------------------------------------------------------------------------
# Packed-slab layout: single (R, 128) f32 slab, one DMA.
#
#   row 0          : w1   (lanes 0..31)                      [Linear(1,32)]
#   row 1          : b1   (lanes 0..31), lane 32 = 1.0 (carry seed)
#   rows 2..7      : zero pad (sublane alignment)
#   rows 8..47     : L2 aug block (40,128): [0:32,0:32]=W2, [32,0:32]=b2,
#                    [32,32]=1.0 (carry), rest 0              [Linear(32,32)]
#   rows 48..87    : L3 aug block (same layout)               [Linear(32,32)]
#   rows 88..127   : L4 aug block: [0:32,0:16]=W4, [32,0:16]=b4,
#                    [32,16]=1.0 (carry moves to lane 16)     [Linear(32,16)]
#   rows 128..     : layer-5 lane chunks, 24 rows per 128 output lanes:
#                    [0:16,:]=W5[:, c*128:(c+1)*128], [16,:]=b5 chunk, rest 0
# ---------------------------------------------------------------------------
_W1_ROW = 0
_B1_ROW = 1
_L2_ROW = 8
_L3_ROW = 48
_L4_ROW = 88
_L5_ROW = 128
_AUG_ROWS = 40     # rows per augmented hidden block
_K_HID = 40        # contraction width for layers 2-4 (32 act + 1 carry + pad)
_L5_BLK = 24       # rows per layer-5 lane chunk
_K_OUT = 24        # contraction width for layer 5 (16 act + 1 carry + pad)
_CARRY_HID = 32    # lane carrying the folded-bias "1" after layers 1-3
_CARRY_OUT = 16    # lane carrying the "1" after layer 4


def _round_up(n, m):
    return ((n + m - 1) // m) * m


# ---------------------------------------------------------------------------
# Pallas kernel: whole 5-layer MLP for one (TM, .) batch tile.
# ---------------------------------------------------------------------------
def _hypernet_kernel(x_ref, slab_ref, out_ref, *, n_chunks):
    x = x_ref[...]                                    # (TM, 1) f32 coefficients

    # layer 1: 1 -> 32 on the VPU (column broadcast).  Bias row has a 1.0 in
    # lane 32, which seeds the carried constant used to fold later biases.
    h = x * slab_ref[_W1_ROW:_W1_ROW + 1, :] + slab_ref[_B1_ROW:_B1_ROW + 1, :]
    h = jnp.maximum(h, 0.0)                           # (TM, 128)

    # layers 2-4: bias-folded MXU matmuls.  RHS slices are sublane-aligned,
    # full-128-lane loads; lanes >= 40 of h are exactly zero so K=40 suffices.
    for row in (_L2_ROW, _L3_ROW, _L4_ROW):
        h = jnp.dot(h[:, :_K_HID], slab_ref[row:row + _K_HID, :],
                    preferred_element_type=jnp.float32)
        h = jnp.maximum(h, 0.0)                       # (TM, 128)

    # layer 5: 16 -> total_out, computed in 128-lane output chunks so the slab
    # stays (R, 128)-compact and every store is a dense 128-lane write.
    h5 = h[:, :_K_OUT]                                # (TM, 24): act(16)+1+pad
    for c in range(n_chunks):
        row = _L5_ROW + c * _L5_BLK
        out_ref[:, c * 128:(c + 1) * 128] = jnp.dot(
            h5, slab_ref[row:row + _K_OUT, :],
            preferred_element_type=jnp.float32)


def _run_kernel(x_flat, slab, out_pad):
    """x_flat: (B,) f32 -> (B_pad, out_pad) f32 raw padded params."""
    B = x_flat.shape[0]
    n_chunks = out_pad // 128
    R = slab.shape[0]
    tile_m = min(128, _round_up(max(B, 1), 8))
    B_pad = _round_up(B, tile_m)
    grid = (B_pad // tile_m,)

    x2 = jnp.zeros((B_pad, 1), jnp.float32).at[:B, 0].set(
        x_flat.astype(jnp.float32))

    flops = 2 * B_pad * (128 + 3 * _K_HID * 128 + _K_OUT * out_pad)
    bytes_accessed = 4 * (B_pad + R * 128 + B_pad * out_pad)

    kernel = functools.partial(_hypernet_kernel, n_chunks=n_chunks)
    return pl.pallas_call(
        kernel,
        out_shape=jax.ShapeDtypeStruct((B_pad, out_pad), jnp.float32),
        grid_spec=pltpu.PrefetchScalarGridSpec(
            num_scalar_prefetch=0,
            grid=grid,
            in_specs=[
                pl.BlockSpec((tile_m, 1), lambda m: (m, 0)),
                pl.BlockSpec((R, 128), lambda m: (0, 0)),   # weights resident
            ],
            out_specs=pl.BlockSpec((tile_m, out_pad), lambda m: (m, 0)),
        ),
        compiler_params=pltpu.CompilerParams(
            dimension_semantics=("parallel",)),
        cost_estimate=pl.CostEstimate(
            flops=flops, transcendentals=0, bytes_accessed=bytes_accessed),
    )(x2, slab)


@functools.partial(jax.jit, static_argnames=("total_w", "total_b", "out_pad"))
def hypernet_forward_single(x, slab, *, total_w, total_b, out_pad):
    """Single coefficient (PyTorch forward): x (1,) -> (net_weight, net_bias)."""
    p = _run_kernel(jnp.reshape(x, (1,)), slab, out_pad)[0]
    return p[:total_w], p[total_w:total_w + total_b]


@functools.partial(jax.jit, static_argnames=("total_w", "total_b", "out_pad"))
def hypernet_forward_batch(x, slab, *, total_w, total_b, out_pad):
    """Batched coefficients: x (B,) -> ((B,total_w), (B,total_b))."""
    B = x.shape[0]
    p = _run_kernel(x, slab, out_pad)[:B]
    return p[:, :total_w], p[:, total_w:total_w + total_b]


# ---------------------------------------------------------------------------
# Hypernet module (parameter init + slab packing + forward glue in plain JAX)
# ---------------------------------------------------------------------------
class Hypernet:
    def __init__(self, in_dim, out_dim, num_layers, hidden_dim, key):
        self.in_dim = in_dim
        self.out_dim = out_dim
        self.num_layers = num_layers
        self.hidden_dim = hidden_dim
        self.total_net_weight = (in_dim * hidden_dim
                                 + (num_layers - 2) * hidden_dim * hidden_dim
                                 + hidden_dim * out_dim)
        self.total_net_bias = (hidden_dim
                               + (num_layers - 2) * hidden_dim
                               + out_dim)
        self.total_out = self.total_net_weight + self.total_net_bias
        self.out_pad = max(128, _round_up(self.total_out, 128))
        self.n_chunks = self.out_pad // 128

        # nn.Sequential(Linear(1,32), ReLU, Linear(32,32), ReLU,
        #               Linear(32,32), ReLU, Linear(32,16), ReLU,
        #               Linear(16, total_out)); weights stored as (in, out).
        dims = [(1, 32), (32, 32), (32, 32), (32, 16), (16, self.total_out)]
        params = []
        for fan_in, fan_out in dims:
            key, kw, kb = jax.random.split(key, 3)
            bound = 1.0 / math.sqrt(fan_in)  # PyTorch default init
            w = jax.random.uniform(kw, (fan_in, fan_out), jnp.float32,
                                   minval=-bound, maxval=bound)
            b = jax.random.uniform(kb, (fan_out,), jnp.float32,
                                   minval=-bound, maxval=bound)
            params.append((w, b))
        self.params = params  # raw params kept for the pure-JAX reference

        # Pack the single weight slab once at init time.
        (w1, b1), (w2, b2), (w3, b3), (w4, b4), (w5, b5) = params
        R = _L5_ROW + self.n_chunks * _L5_BLK
        slab = jnp.zeros((R, 128), jnp.float32)
        slab = slab.at[_W1_ROW, 0:32].set(w1[0])
        slab = slab.at[_B1_ROW, 0:32].set(b1)
        slab = slab.at[_B1_ROW, _CARRY_HID].set(1.0)          # carry seed
        for row, (w, b) in ((_L2_ROW, (w2, b2)), (_L3_ROW, (w3, b3))):
            slab = slab.at[row:row + 32, 0:32].set(w)
            slab = slab.at[row + 32, 0:32].set(b)              # folded bias
            slab = slab.at[row + 32, _CARRY_HID].set(1.0)      # re-emit carry
        slab = slab.at[_L4_ROW:_L4_ROW + 32, 0:16].set(w4)
        slab = slab.at[_L4_ROW + 32, 0:16].set(b4)
        slab = slab.at[_L4_ROW + 32, _CARRY_OUT].set(1.0)
        w5p = jnp.zeros((16, self.out_pad), jnp.float32).at[:, :self.total_out].set(w5)
        b5p = jnp.zeros((self.out_pad,), jnp.float32).at[:self.total_out].set(b5)
        for c in range(self.n_chunks):
            row = _L5_ROW + c * _L5_BLK
            slab = slab.at[row:row + 16, :].set(w5p[:, c * 128:(c + 1) * 128])
            slab = slab.at[row + 16, :].set(b5p[c * 128:(c + 1) * 128])
        self.slab = slab

    def __call__(self, x):
        # x: (1,) f32 PDE coefficient — matches the torch forward, which
        # slices the 1-D params vector on dim 0.
        return hypernet_forward_single(
            jnp.asarray(x, jnp.float32).reshape(-1)[:1], self.slab,
            total_w=self.total_net_weight, total_b=self.total_net_bias,
            out_pad=self.out_pad)

    def forward_batch(self, x):
        # x: (B,) f32 coefficients -> ((B, total_w), (B, total_b)).
        return hypernet_forward_batch(
            jnp.asarray(x, jnp.float32).reshape(-1), self.slab,
            total_w=self.total_net_weight, total_b=self.total_net_bias,
            out_pad=self.out_pad)

    # Pure-JAX reference (raw, unpacked params) for correctness checks.
    def reference_batch(self, xb):
        h = jnp.asarray(xb, jnp.float32).reshape(-1, 1)
        for i, (w, b) in enumerate(self.params):
            h = jnp.dot(h, w, precision=jax.lax.Precision.HIGHEST) + b[None, :]
            if i < len(self.params) - 1:
                h = jnp.maximum(h, 0.0)
        return (h[:, :self.total_net_weight],
                h[:, self.total_net_weight:
                  self.total_net_weight + self.total_net_bias])

    def reference(self, x):
        w, b = self.reference_batch(jnp.reshape(x, (1,)))
        return w[0], b[0]


if __name__ == "__main__":
    key = jax.random.PRNGKey(0)
    kparams, kx, kb = jax.random.split(key, 3)

    # Small, forward-consistent target-PINN config:
    #   in_dim=2 (x,t), out_dim=1 (u), num_layers=3, hidden_dim=16
    net = Hypernet(in_dim=2, out_dim=1, num_layers=3, hidden_dim=16, key=kparams)

    # --- single-coefficient path (exact PyTorch forward semantics) ---------
    x = jax.random.uniform(kx, (1,), jnp.float32)
    net_weight, net_bias = net(x)
    jax.block_until_ready((net_weight, net_bias))
    ref_w, ref_b = net.reference(x)
    assert net_weight.shape == (net.total_net_weight,)
    assert net_bias.shape == (net.total_net_bias,)
    assert jnp.allclose(net_weight, ref_w, atol=1e-5, rtol=1e-5)
    assert jnp.allclose(net_bias, ref_b, atol=1e-5, rtol=1e-5)

    # --- batched path (grid > 1, parallel tiles, padded/trimmed batch) -----
    xb = jax.random.uniform(kb, (300,), jnp.float32)
    wb, bb = net.forward_batch(xb)
    jax.block_until_ready((wb, bb))
    ref_wb, ref_bb = net.reference_batch(xb)
    assert wb.shape == (300, net.total_net_weight)
    assert bb.shape == (300, net.total_net_bias)
    assert jnp.allclose(wb, ref_wb, atol=1e-5, rtol=1e-5)
    assert jnp.allclose(bb, ref_bb, atol=1e-5, rtol=1e-5)

    print("KERNEL_OK")
</pallas_src>

<mosaic_0001>
module attributes {stable_mosaic.version = 11 : i64} {
  func.func @_hypernet_kernel(%arg0: i32, %arg1: memref<8x1xf32, #tpu.memory_space<vmem>>, %arg2: memref<200x128xf32, #tpu.memory_space<vmem>>, %arg3: memref<8x384xf32, #tpu.memory_space<vmem>>) attributes {dimension_semantics = [#tpu.dimension_semantics<parallel>], iteration_bounds = array<i64: 1>, scalar_prefetch = 0 : i64, scratch_operands = 0 : i64, tpu.core_type = #tpu.core_type<tc>, window_params = [{transform_indices = @transform_0, window_bounds = array<i64: 8, 1>}, {pipeline_mode = #tpu.pipeline_mode<synchronous>, transform_indices = @transform_1, window_bounds = array<i64: 200, 128>}, {transform_indices = @transform_2, window_bounds = array<i64: 8, 384>}]} {
    %c0 = arith.constant 0 : index
    %c0_0 = arith.constant 0 : index
    %0 = vector.load %arg1[%c0, %c0_0] : memref<8x1xf32, #tpu.memory_space<vmem>>, vector<8x1xf32>
    %c0_1 = arith.constant 0 : index
    %c0_2 = arith.constant 0 : index
    %1 = vector.load %arg2[%c0_1, %c0_2] : memref<200x128xf32, #tpu.memory_space<vmem>>, vector<1x128xf32>
    %2 = vector.broadcast %0 : vector<8x1xf32> to vector<8x128xf32>
    %3 = vector.broadcast %1 : vector<1x128xf32> to vector<8x128xf32>
    %4 = arith.mulf %2, %3 : vector<8x128xf32>
    %c1 = arith.constant 1 : index
    %c0_3 = arith.constant 0 : index
    %5 = vector.load %arg2[%c1, %c0_3] : memref<200x128xf32, #tpu.memory_space<vmem>>, vector<1x128xf32>
    %6 = vector.broadcast %5 : vector<1x128xf32> to vector<8x128xf32>
    %7 = arith.addf %4, %6 : vector<8x128xf32>
    %cst = arith.constant 0.000000e+00 : f32
    %8 = vector.broadcast %cst : f32 to vector<8x128xf32>
    %9 = arith.maximumf %7, %8 : vector<8x128xf32>
    %10 = vector.extract_strided_slice %9 {offsets = [0, 0], sizes = [8, 40], strides = [1, 1]} : vector<8x128xf32> to vector<8x40xf32>
    %c8 = arith.constant 8 : index
    %c0_4 = arith.constant 0 : index
    %11 = vector.load %arg2[%c8, %c0_4] : memref<200x128xf32, #tpu.memory_space<vmem>>, vector<40x128xf32>
    %cst_5 = arith.constant dense<0.000000e+00> : vector<8x128xf32>
    %12 = tpu.matmul %10, %11, %cst_5 {dimension_numbers = #tpu.dot_dimension_numbers<[1], [0], [0], [1], [0, 0, 1, 1], [], []>} : vector<8x40xf32>, vector<40x128xf32>, vector<8x128xf32> -> vector<8x128xf32>
    %cst_6 = arith.constant 0.000000e+00 : f32
    %13 = vector.broadcast %cst_6 : f32 to vector<8x128xf32>
    %14 = arith.maximumf %12, %13 : vector<8x128xf32>
    %15 = vector.extract_strided_slice %14 {offsets = [0, 0], sizes = [8, 40], strides = [1, 1]} : vector<8x128xf32> to vector<8x40xf32>
    %c48 = arith.constant 48 : index
    %c0_7 = arith.constant 0 : index
    %16 = vector.load %arg2[%c48, %c0_7] : memref<200x128xf32, #tpu.memory_space<vmem>>, vector<40x128xf32>
    %cst_8 = arith.constant dense<0.000000e+00> : vector<8x128xf32>
    %17 = tpu.matmul %15, %16, %cst_8 {dimension_numbers = #tpu.dot_dimension_numbers<[1], [0], [0], [1], [0, 0, 1, 1], [], []>} : vector<8x40xf32>, vector<40x128xf32>, vector<8x128xf32> -> vector<8x128xf32>
    %cst_9 = arith.constant 0.000000e+00 : f32
    %18 = vector.broadcast %cst_9 : f32 to vector<8x128xf32>
    %19 = arith.maximumf %17, %18 : vector<8x128xf32>
    %20 = vector.extract_strided_slice %19 {offsets = [0, 0], sizes = [8, 40], strides = [1, 1]} : vector<8x128xf32> to vector<8x40xf32>
    %c88 = arith.constant 88 : index
    %c0_10 = arith.constant 0 : index
    %21 = vector.load %arg2[%c88, %c0_10] : memref<200x128xf32, #tpu.memory_space<vmem>>, vector<40x128xf32>
    %cst_11 = arith.constant dense<0.000000e+00> : vector<8x128xf32>
    %22 = tpu.matmul %20, %21, %cst_11 {dimension_numbers = #tpu.dot_dimension_numbers<[1], [0], [0], [1], [0, 0, 1, 1], [], []>} : vector<8x40xf32>, vector<40x128xf32>, vector<8x128xf32> -> vector<8x128xf32>
    %cst_12 = arith.constant 0.000000e+00 : f32
    %23 = vector.broadcast %cst_12 : f32 to vector<8x128xf32>
    %24 = arith.maximumf %22, %23 : vector<8x128xf32>
    %25 = vector.extract_strided_slice %24 {offsets = [0, 0], sizes = [8, 24], strides = [1, 1]} : vector<8x128xf32> to vector<8x24xf32>
    %c128 = arith.constant 128 : index
    %c0_13 = arith.constant 0 : index
    %26 = vector.load %arg2[%c128, %c0_13] : memref<200x128xf32, #tpu.memory_space<vmem>>, vector<24x128xf32>
    %cst_14 = arith.constant dense<0.000000e+00> : vector<8x128xf32>
    %27 = tpu.matmul %25, %26, %cst_14 {dimension_numbers = #tpu.dot_dimension_numbers<[1], [0], [0], [1], [0, 0, 1, 1], [], []>} : vector<8x24xf32>, vector<24x128xf32>, vector<8x128xf32> -> vector<8x128xf32>
    %c0_15 = arith.constant 0 : index
    %c0_16 = arith.constant 0 : index
    %28 = vector.load %arg3[%c0_15, %c0_16] : memref<8x384xf32, #tpu.memory_space<vmem>>, vector<8x128xf32>
    tpu.vector_store %arg3[%c0_15, %c0_16], %27 {strides = array<i32>} : memref<8x384xf32, #tpu.memory_space<vmem>>, vector<8x128xf32>,
    %c152 = arith.constant 152 : index
    %c0_17 = arith.constant 0 : index
    %29 = vector.load %arg2[%c152, %c0_17] : memref<200x128xf32, #tpu.memory_space<vmem>>, vector<24x128xf32>
    %cst_18 = arith.constant dense<0.000000e+00> : vector<8x128xf32>
    %30 = tpu.matmul %25, %29, %cst_18 {dimension_numbers = #tpu.dot_dimension_numbers<[1], [0], [0], [1], [0, 0, 1, 1], [], []>} : vector<8x24xf32>, vector<24x128xf32>, vector<8x128xf32> -> vector<8x128xf32>
    %c0_19 = arith.constant 0 : index
    %c128_20 = arith.constant 128 : index
    %31 = vector.load %arg3[%c0_19, %c128_20] : memref<8x384xf32, #tpu.memory_space<vmem>>, vector<8x128xf32>
    tpu.vector_store %arg3[%c0_19, %c128_20], %30 {strides = array<i32>} : memref<8x384xf32, #tpu.memory_space<vmem>>, vector<8x128xf32>,
    %c176 = arith.constant 176 : index
    %c0_21 = arith.constant 0 : index
    %32 = vector.load %arg2[%c176, %c0_21] : memref<200x128xf32, #tpu.memory_space<vmem>>, vector<24x128xf32>
    %cst_22 = arith.constant dense<0.000000e+00> : vector<8x128xf32>
    %33 = tpu.matmul %25, %32, %cst_22 {dimension_numbers = #tpu.dot_dimension_numbers<[1], [0], [0], [1], [0, 0, 1, 1], [], []>} : vector<8x24xf32>, vector<24x128xf32>, vector<8x128xf32> -> vector<8x128xf32>
    %c0_23 = arith.constant 0 : index
    %c256 = arith.constant 256 : index
    %34 = vector.load %arg3[%c0_23, %c256] : memref<8x384xf32, #tpu.memory_space<vmem>>, vector<8x128xf32>
    tpu.vector_store %arg3[%c0_23, %c256], %33 {strides = array<i32>} : memref<8x384xf32, #tpu.memory_space<vmem>>, vector<8x128xf32>,
    return
  }
  func.func @transform_0(%arg0: i32) -> (i32, i32) {
    %c0_i32 = arith.constant 0 : i32
    %c0_i32_0 = arith.constant 0 : i32
    return %arg0, %c0_i32 : i32, i32
  }
  func.func @transform_1(%arg0: i32) -> (i32, i32) {
    %c0_i32 = arith.constant 0 : i32
    %c0_i32_0 = arith.constant 0 : i32
    %c0_i32_1 = arith.constant 0 : i32
    return %c0_i32, %c0_i32_0 : i32, i32
  }
  func.func @transform_2(%arg0: i32) -> (i32, i32) {
    %c0_i32 = arith.constant 0 : i32
    %c0_i32_0 = arith.constant 0 : i32
    return %arg0, %c0_i32 : i32, i32
  }
}

</mosaic_0001>

<bundles_post_ra>
// kernel: hypernet_forward_single.1
= control target key start
LH: loop header
LB: loop body
LE: loop exit
PB: predicated region body
PF: predicated region fallthrough
CT: control target
= control target key end

     0   :  { %7 = vsyncpa [#allocation3], 0  ;;  %s676_s9 = smov [#allocation2]   ;;  %s752_s0 = inlined_call_operand.vmem [shape: f32[8,1], index: 0, kind: input, shape index: {}]   ;;  %s753_s1 = inlined_call_operand.hbm [shape: f32[200,128], index: 1, kind: input, shape index: {}]   ;;  %s754_s2 = inlined_call_operand.vmem [shape: f32[8,384], index: 2, kind: output, shape index: {}]  }
   0x1   :  { %s15_s10 = sshll.u32 %s676_s9, 4  ;;  %s652_s13 = scalar_lea.hbm %s753_s1, 3200  ;;  %s16_s10 = int_to_ptr.vmem [resolvable:$true] %s15_s10 }
   0x2   :  { %p653_p0 = scmp.ne.s32.totalorder %s753_s1, %s652_s13  ;;  %p656_p1 = scmp.lt.u32.totalorder %s652_s13, %s753_s1 }
   0x4   :  { %p658_p2 = pnand %p656_p1, %p653_p0 }
   0x6   :  { %661 = shalt.err (!%p658_p2)
}
   0x7   :  { %s662_s18 = scalar_lea.vmem %s16_s10, 3200  ;;  %p667_p4 = scmp.lt.s32.totalorder %s16_s10, %s16_s10 }
   0x8   :  { %p663_p3 = scmp.ne.s32.totalorder %s16_s10, %s662_s18  ;;  %p668_p5 = scmp.lt.s32.totalorder %s662_s18, %s662_s18 }
   0xa   :  { %p669_p6 = por %p668_p5, %p667_p4 }
   0xc   :  { %p670_p7 = pnand %p669_p6, %p663_p3 }
   0xe   :  { %673 = shalt.err (!%p670_p7)
}
   0xf   :  { %s677_s19 = smov 128   ;;  %s678_s20 = smov 8  }
  0x10   :  { %21 = dma.hbm_to_vmem [thread:$0]  %s753_s1, 3200, %s16_s10, [#allocation3], %s677_s19, %s677_s19, %s678_s20  }
  0x11   :  { %674 = dma.done.wait [#allocation3], 3200  }
  0x12   :  { %675 = vsyncadd [#allocation3], 4294964096  ;;  %v679_v0 = vmov 0   ;;  %v680_v1 = vmov 0.0|0.0   ;;  %v25_v2 = vld [vmem:[%s752_s0] sm:$0xff]  ;;  %v44_v3 = vld [vmem:[#allocation2 + $0x8] sm:$0xff] }
  0x13   :  { %651 = vset.pattern.permute.xlu0 %v679_v0  ;;  %617 = vmatprep.subr.bf16.mxu0 %v680_v1  ;;  %v45_v4 = vld [vmem:[#allocation2 + $0x10] sm:$0xff]  ;;  %v46_v6 = vld [vmem:[#allocation2 + $0x18] sm:$0xff]  ;;  %v47_v7 = vld [vmem:[#allocation2 + $0x20] sm:$0xff]  ;;  %vm681_vm0 = vmmov 0   ;;  %v682_v9 = vmov 0.0   ;;  %vm49_vm1 = vcmask 326656  }
  0x14   :  { %623 = vmatprep.subr.bf16.mxu1 %v680_v1  ;;  %29 = vperm.xlu0 %651, %v25_v2   ;;  %v618_v5 = vpack.c.bf16 %v45_v4, %v44_v3  ;;  %v621_v8 = vpack.c.bf16 %v47_v7, %v46_v6  ;;  %v124_v10 = vld [vmem:[#allocation2 + $0x30] sm:$0xff]  ;;  %v125_v11 = vld [vmem:[#allocation2 + $0x38] sm:$0xff]  ;;  %v126_v12 = vld [vmem:[#allocation2 + $0x40] sm:$0xff]  ;;  %vm285_vm2 = vcmask 195584  }
  0x15   :  { %561 = vmatprep.mubr.msk.f32.mxu0 %vm681_vm0, %v682_v9  ;;  %574 = vmatprep.mubr.msk.f32.mxu1 %vm681_vm0, %v682_v9  ;;  %v48_v13 = vld [vmem:[#allocation2 + $0x28] sm:$0xff]  ;;  %v624_v14 = vpack.c.bf16 %v125_v11, %v124_v10  ;;  %v513_v17 = vld [vmem:[#allocation2] ss:$0 sm:$0xff]  ;;  %v514_v18 = vld [vmem:[#allocation2 + $0x1] ss:$0 sm:$0xff] }
  0x16   :  { %619 = vmatpush3.bf16.msra.mxu0 %v618_v5  ;;  %v127_v15 = vld [vmem:[#allocation2 + $0x48] sm:$0xff]  ;;  %v128_v23 = vld [vmem:[#allocation2 + $0x50] sm:$0xff]  ;;  %v203_v24 = vld [vmem:[#allocation2 + $0x58] sm:$0xff] }
  0x17   :  { %620 = vmatprep.subr.bf16.mxu0 %v680_v1  ;;  %625 = vmatpush3.bf16.msra.mxu1 %v624_v14  ;;  %v627_v16 = vpack.c.bf16 %v127_v15, %v126_v12  ;;  %v204_v25 = vld [vmem:[#allocation2 + $0x60] sm:$0xff]  ;;  %v205_v26 = vld [vmem:[#allocation2 + $0x68] sm:$0xff]  ;;  %v206_v28 = vld [vmem:[#allocation2 + $0x70] sm:$0xff] }
  0x18   :  { %626 = vmatprep.subr.bf16.mxu1 %v680_v1  ;;  %v630_v27 = vpack.c.bf16 %v204_v25, %v203_v24  ;;  %v633_v29 = vpack.c.bf16 %v206_v28, %v205_v26  ;;  %v207_v33 = vld [vmem:[#allocation2 + $0x78] sm:$0xff]  ;;  %v282_v34 = vld [vmem:[#allocation2 + $0x80] sm:$0xff]  ;;  %v283_v35 = vld [vmem:[#allocation2 + $0x88] sm:$0xff] }
  0x19   :  { %v636_v36 = vpack.c.bf16 %v283_v35, %v282_v34  ;;  %v434_v37 = vld [vmem:[#allocation2 + $0xb0] sm:$0xff]  ;;  %v435_v38 = vld [vmem:[#allocation2 + $0xb8] sm:$0xff]  ;;  %v436_v44 = vld [vmem:[#allocation2 + $0xc0] sm:$0xff] }
  0x1a   :  { %622 = vmatpush3.bf16.msra.mxu0 %v621_v8  ;;  %v642_v40 = vpack.c.bf16 %v435_v38, %v434_v37  ;;  %v284_v43 = vld [vmem:[#allocation2 + $0x90] sm:$0xff]  ;;  %v360_v45 = vld [vmem:[#allocation2 + $0x98] sm:$0xff]  ;;  %v361_v46 = vld [vmem:[#allocation2 + $0xa0] sm:$0xff] }
  0x1b   :  { %559 = vmatprep.subr.mxu0 %v682_v9  ;;  %628 = vmatpush3.bf16.msra.mxu1 %v627_v16  ;;  %v639_v48 = vpack.c.bf16 %v361_v46, %v360_v45  ;;  %v362_v51 = vld [vmem:[#allocation2 + $0xa8] sm:$0xff] }
  0x1c   :  { %572 = vmatprep.subr.mxu1 %v682_v9 }
  0x1e   :  { %560 = vmatpush3.msra.mxu0 %v48_v13 }
  0x1f   :  { %629 = vmatprep.subr.bf16.mxu0 %v680_v1  ;;  %573 = vmatpush3.msra.mxu1 %v128_v23 }
  0x20   :  { %635 = vmatprep.subr.bf16.mxu1 %v680_v1 }
  0x93   :  { %v30_v19 = vpop.permute.xlu0 %29 }
  0x94   :  { %v36_v20 = vmul.f32 %v513_v17, %v30_v19 }
  0x96   :  { %v42_v21 = vadd.f32 %v514_v18, %v36_v20 }
  0x98   :  { %v43_v22 = vmax.f32 %v42_v21, 0.0 }
  0x9a   :  { %562 = vmatmul.mubr.msk.f32.vlgmr.msra.gmra.mrb[0].mxu0 %vm49_vm1, %v43_v22 }
  0x9b   :  { %587 = vmatprep.mubr.msk.f32.mxu0 %vm681_vm0, %v682_v9  ;;  %631 = vmatpush3.bf16.msra.mxu0 %v630_v27 }
  0x9c   :  { %632 = vmatprep.subr.bf16.mxu0 %v680_v1 }
  0x9f   :  { %634 = vmatpush3.bf16.msra.mxu0 %v633_v29 }
  0xa0   :  { %585 = vmatprep.subr.mxu0 %v682_v9 }
  0xa3   :  { %586 = vmatpush3.msra.mxu0 %v207_v33 }
  0xa4   :  { %641 = vmatprep.subr.bf16.mxu0 %v680_v1 }
 0x16d   :  { %v119_v30 = vpop.f32.mrb[0].mxu0 }
 0x16e   :  { %v123_v31 = vmax.f32 %v119_v30, 0.0  ;;  %v563_v32 = vpop.f32.mrb[1].mxu0 }
 0x170   :  { %575 = vmatmul.mubr.msk.f32.vlgmr.msra.gmra.mrb[0].mxu1 %vm49_vm1, %v123_v31 }
 0x171   :  { %596 = vmatprep.mubr.msk.f32.mxu1 %vm681_vm0, %v682_v9  ;;  %637 = vmatpush3.bf16.msra.mxu1 %v636_v36 }
 0x172   :  { %594 = vmatprep.subr.mxu1 %v682_v9 }
 0x175   :  { %595 = vmatpush3.msra.mxu1 %v284_v43 }
 0x176   :  { %638 = vmatprep.subr.bf16.mxu1 %v680_v1 }
 0x243   :  { %v198_v39 = vpop.f32.mrb[0].mxu1 }
 0x244   :  { %v202_v41 = vmax.f32 %v198_v39, 0.0  ;;  %v576_v42 = vpop.f32.mrb[1].mxu1 }
 0x246   :  { %588 = vmatmul.mubr.msk.f32.vlgmr.msra.gmra.mrb[2].mxu0 %vm49_vm1, %v202_v41 }
 0x247   :  { %643 = vmatpush3.bf16.msra.mxu0 %v642_v40  ;;  %614 = vmatprep.mubr.msk.f32.mxu0 %vm681_vm0, %v682_v9 }
 0x248   :  { %612 = vmatprep.subr.mxu0 %v682_v9 }
 0x24b   :  { %613 = vmatpush3.msra.mxu0 %v436_v44 }
 0x319   :  { %v277_v47 = vpop.f32.mrb[2].mxu0 }
 0x31a   :  { %v281_v49 = vmax.f32 %v277_v47, 0.0  ;;  %v589_v50 = vpop.f32.mrb[3].mxu0 }
 0x31c   :  { %597 = vmatmul.mubr.msk.f32.vlgmr.msra.gmra.mrb[2].mxu1 %vm285_vm2, %v281_v49  ;;  %615 = vmatmul.mubr.msk.f32.vlgmr.msra.gmra.mrb[4].mxu0 %vm285_vm2, %v281_v49 }
 0x31d   :  { %640 = vmatpush3.bf16.msra.mxu1 %v639_v48  ;;  %605 = vmatprep.mubr.msk.f32.mxu1 %vm681_vm0, %v682_v9 }
 0x31e   :  { %603 = vmatprep.subr.mxu1 %v682_v9 }
 0x321   :  { %604 = vmatpush3.msra.mxu1 %v362_v51 }
 0x322   :  { %606 = vmatmul.mubr.msk.f32.vlgmr.msra.gmra.mrb[4].mxu1 %vm285_vm2, %v281_v49 }
 0x3ef   :  { %v355_v52 = vpop.f32.mrb[2].mxu1  ;;  %v503_v53 = vpop.f32.mrb[4].mxu0 }
 0x3f0   :  { %359 = vst [vmem:[%s754_s2] sm:$0xff] %v355_v52  ;;  %507 = vst [vmem:[%s754_s2 + $0x10] sm:$0xff] %v503_v53  ;;  %v598_v54 = vpop.f32.mrb[3].mxu1  ;;  %v616_v55 = vpop.f32.mrb[5].mxu0 }
 0x3f5   :  { %v429_v56 = vpop.f32.mrb[4].mxu1 }
 0x3f6   :  { %433 = vst [vmem:[%s754_s2 + $0x8] sm:$0xff] %v429_v56  ;;  %v607_v57 = vpop.f32.mrb[5].mxu1 }
 0x3f7   :  { %512 = vsyncpa [#allocation3], 1 }

</bundles_post_ra>
